<compile_context>
chip_gen: v6e
topology: v6e:2x2x1
jax: 0.10.0
libtpu: 0.0.40
codegen_flags: <defaults>
</compile_context>

<pallas_src>
import functools
import math

import jax
import jax.numpy as jnp
from jax.experimental import pallas as pl
from jax.experimental.pallas import tpu as pltpu


# ---------------------------------------------------------------------------
# VMEM budget / tiling helpers (generation aware)
# ---------------------------------------------------------------------------

def _vmem_cap_bytes():
    try:
        info = pltpu.get_tpu_info()
        for attr in ("vmem_capacity_bytes", "vmem_size_bytes"):
            cap = getattr(info, attr, None)
            if cap:
                return int(cap)
    except Exception:
        pass
    return 64 << 20  # conservative default (v7x physical VMEM)


# Leave >=40% of physical VMEM for compiler scratch / other buffers.
_VMEM_BUDGET = max(min(int(_vmem_cap_bytes() * 0.6), 48 << 20), 24 << 20)


def _vmem_limit(need_bytes):
    need = int(need_bytes) + (4 << 20)
    if need <= _VMEM_BUDGET:
        return int(max(need, 16 << 20))
    return int(need)  # oversized fallback; tile picker normally prevents this


def _tile(n, target, align):
    """Largest tile <= target that divides n exactly (multiple of align), else full n."""
    if n <= target:
        return int(n)
    t = (target // align) * align
    while t >= align:
        if n % t == 0:
            return int(t)
        t -= align
    return int(n)


def _m_tile(m):
    """Row tile for the matmul M axis (cdiv grid; partial last block is safe)."""
    return int(m) if m <= 256 else 256


def _row_tile(rows, dim, itemsize, sublane=8):
    """Row tile for row-wise elementwise kernels: ~2 MiB blocks (mem-bound roofline)."""
    if rows <= 256:
        return int(rows)
    budget = 2 * 1024 * 1024
    t = budget // max(1, dim * itemsize)
    t = max(sublane, min(int(t), 1024, rows))
    return max(sublane, (t // sublane) * sublane)


def _sublane_for(dtype):
    return {4: 8, 2: 16, 1: 32}.get(jnp.dtype(dtype).itemsize, 8)


def _pick_linear_tiles(M, K, N, n_w=1, extra_mn_inputs=0):
    """Pick (tm, tk, tn, vmem_estimate) so double-buffered tiles fit the budget."""
    tm = _m_tile(M)

    def est(tk, tn):
        in_elems = tm * tk + n_w * (tk * tn + tn) + extra_mn_inputs * tm * tn
        return (2 * (in_elems + tm * tn) + n_w * tm * tn) * 4

    for tk_t, tn_t in ((1024, 512), (512, 512), (512, 256), (256, 256),
                       (256, 128), (128, 128)):
        tk = _tile(K, tk_t, 128)
        tn = _tile(N, tn_t, 128)
        if est(tk, tn) <= _VMEM_BUDGET:
            return tm, tk, tn, est(tk, tn)
    tk = _tile(K, 128, 128)
    tn = _tile(N, 128, 128)
    return tm, tk, tn, est(tk, tn)


# ---------------------------------------------------------------------------
# RMSNorm kernel
# ---------------------------------------------------------------------------

def _rmsnorm_kernel(x_ref, g_ref, o_ref, *, eps):
    x = x_ref[...].astype(jnp.float32)                     # (row_tile, dim)
    g = g_ref[...].astype(jnp.float32)                     # (1, dim)
    mean_sq = jnp.mean(x * x, axis=-1, keepdims=True)
    inv = jax.lax.rsqrt(mean_sq + eps)
    o_ref[...] = (x * inv * g).astype(o_ref.dtype)


def rmsnorm_pallas(x, gamma, eps=1e-6):
    orig_shape = x.shape
    dim = orig_shape[-1]
    x2d = x.reshape(-1, dim)
    rows = x2d.shape[0]
    itemsize = x2d.dtype.itemsize
    rt = _row_tile(rows, dim, itemsize, _sublane_for(x2d.dtype))
    tile_bytes = rt * dim * itemsize

    out = pl.pallas_call(
        functools.partial(_rmsnorm_kernel, eps=eps),
        out_shape=jax.ShapeDtypeStruct((rows, dim), x.dtype),
        grid_spec=pltpu.PrefetchScalarGridSpec(
            num_scalar_prefetch=0,
            grid=(pl.cdiv(rows, rt),),
            in_specs=[
                pl.BlockSpec((rt, dim), lambda i: (i, 0)),
                pl.BlockSpec((1, dim), lambda i: (0, 0)),
            ],
            out_specs=pl.BlockSpec((rt, dim), lambda i: (i, 0)),
        ),
        compiler_params=pltpu.CompilerParams(
            dimension_semantics=("parallel",),
            vmem_limit_bytes=_vmem_limit(4 * tile_bytes + dim * itemsize),
        ),
        cost_estimate=pl.CostEstimate(
            flops=3 * rows * dim,
            transcendentals=rows,
            bytes_accessed=(2 * rows * dim + dim) * itemsize),
    )(x2d, gamma.reshape(1, dim))
    return out.reshape(orig_shape)


def rmsnorm_reference(x, gamma, eps=1e-6):
    norm = jax.lax.rsqrt(jnp.mean(x.astype(jnp.float32) ** 2,
                                  axis=-1, keepdims=True) + eps)
    return (x * norm * gamma).astype(x.dtype)


# ---------------------------------------------------------------------------
# Linear kernels: y = x @ W + b  (optionally + residual, fused epilogue)
# ---------------------------------------------------------------------------

def _linear_bias_kernel(x_ref, w_ref, b_ref, o_ref, acc_ref):
    k = pl.program_id(2)

    @pl.when(k == 0)
    def _():
        acc_ref[...] = jnp.zeros_like(acc_ref)

    acc_ref[...] += jnp.dot(x_ref[...], w_ref[...],
                            preferred_element_type=jnp.float32)

    @pl.when(k == pl.num_programs(2) - 1)
    def _():
        o_ref[...] = (acc_ref[...] + b_ref[...].astype(jnp.float32)).astype(o_ref.dtype)


def _linear_bias_res_kernel(x_ref, w_ref, b_ref, r_ref, o_ref, acc_ref):
    k = pl.program_id(2)

    @pl.when(k == 0)
    def _():
        acc_ref[...] = jnp.zeros_like(acc_ref)

    acc_ref[...] += jnp.dot(x_ref[...], w_ref[...],
                            preferred_element_type=jnp.float32)

    @pl.when(k == pl.num_programs(2) - 1)
    def _():
        o_ref[...] = (acc_ref[...] + b_ref[...].astype(jnp.float32)
                      + r_ref[...].astype(jnp.float32)).astype(o_ref.dtype)


def linear_pallas(x, w, b, residual=None):
    """y = x @ w + b (+ residual) ; x: (..., K), w: (K, N), b: (N,)."""
    orig_shape = x.shape
    K = orig_shape[-1]
    N = w.shape[1]
    x2d = x.reshape(-1, K)
    M = x2d.shape[0]
    has_res = residual is not None

    tm, tk, tn, est = _pick_linear_tiles(M, K, N, n_w=1,
                                         extra_mn_inputs=1 if has_res else 0)
    grid = (pl.cdiv(M, tm), N // tn, K // tk)

    in_specs = [pl.BlockSpec((tm, tk), lambda i, j, k: (i, k)),
                pl.BlockSpec((tk, tn), lambda i, j, k: (k, j)),
                pl.BlockSpec((1, tn), lambda i, j, k: (0, j))]
    args = [x2d, w, b.reshape(1, N)]
    if has_res:
        in_specs.append(pl.BlockSpec((tm, tn), lambda i, j, k: (i, j)))
        args.append(residual.reshape(M, N))
        kernel = _linear_bias_res_kernel
    else:
        kernel = _linear_bias_kernel

    out = pl.pallas_call(
        kernel,
        out_shape=jax.ShapeDtypeStruct((M, N), x.dtype),
        grid_spec=pltpu.PrefetchScalarGridSpec(
            num_scalar_prefetch=0,
            grid=grid,
            in_specs=in_specs,
            out_specs=pl.BlockSpec((tm, tn), lambda i, j, k: (i, j)),
            scratch_shapes=[pltpu.VMEM((tm, tn), jnp.float32)],
        ),
        compiler_params=pltpu.CompilerParams(
            dimension_semantics=("parallel", "parallel", "arbitrary"),
            vmem_limit_bytes=_vmem_limit(est),
        ),
        cost_estimate=pl.CostEstimate(
            flops=2 * M * N * K + (M * N if has_res else 0),
            transcendentals=0,
            bytes_accessed=(M * K + K * N + M * N + N
                            + (M * N if has_res else 0)) * 4),
    )(*args)
    return out.reshape(*orig_shape[:-1], N)


# ---------------------------------------------------------------------------
# Fused gate/up + SwiGLU kernel:  silu(x@Wg+bg) * (x@Wu+bu)
# ---------------------------------------------------------------------------

def _linear_swiglu_kernel(x_ref, wg_ref, bg_ref, wu_ref, bu_ref, o_ref,
                          accg_ref, accu_ref):
    k = pl.program_id(2)

    @pl.when(k == 0)
    def _():
        accg_ref[...] = jnp.zeros_like(accg_ref)
        accu_ref[...] = jnp.zeros_like(accu_ref)

    x = x_ref[...]
    accg_ref[...] += jnp.dot(x, wg_ref[...], preferred_element_type=jnp.float32)
    accu_ref[...] += jnp.dot(x, wu_ref[...], preferred_element_type=jnp.float32)

    @pl.when(k == pl.num_programs(2) - 1)
    def _():
        g = accg_ref[...] + bg_ref[...].astype(jnp.float32)
        u = accu_ref[...] + bu_ref[...].astype(jnp.float32)
        o_ref[...] = (g * jax.nn.sigmoid(g) * u).astype(o_ref.dtype)


def linear_swiglu_pallas(x, wg, bg, wu, bu):
    orig_shape = x.shape
    K = orig_shape[-1]
    N = wg.shape[1]
    x2d = x.reshape(-1, K)
    M = x2d.shape[0]

    tm, tk, tn, est = _pick_linear_tiles(M, K, N, n_w=2)
    grid = (pl.cdiv(M, tm), N // tn, K // tk)

    out = pl.pallas_call(
        _linear_swiglu_kernel,
        out_shape=jax.ShapeDtypeStruct((M, N), x.dtype),
        grid_spec=pltpu.PrefetchScalarGridSpec(
            num_scalar_prefetch=0,
            grid=grid,
            in_specs=[pl.BlockSpec((tm, tk), lambda i, j, k: (i, k)),
                      pl.BlockSpec((tk, tn), lambda i, j, k: (k, j)),
                      pl.BlockSpec((1, tn), lambda i, j, k: (0, j)),
                      pl.BlockSpec((tk, tn), lambda i, j, k: (k, j)),
                      pl.BlockSpec((1, tn), lambda i, j, k: (0, j))],
            out_specs=pl.BlockSpec((tm, tn), lambda i, j, k: (i, j)),
            scratch_shapes=[pltpu.VMEM((tm, tn), jnp.float32),
                            pltpu.VMEM((tm, tn), jnp.float32)],
        ),
        compiler_params=pltpu.CompilerParams(
            dimension_semantics=("parallel", "parallel", "arbitrary"),
            vmem_limit_bytes=_vmem_limit(est),
        ),
        cost_estimate=pl.CostEstimate(
            flops=4 * M * N * K + 4 * M * N,
            transcendentals=M * N,
            bytes_accessed=(M * K + 2 * K * N + 2 * N + M * N) * 4),
    )(x2d, wg, bg.reshape(1, N), wu, bu.reshape(1, N))
    return out.reshape(*orig_shape[:-1], N)


# ---------------------------------------------------------------------------
# Multi-head attention kernel
#   * grid (B, n_q_tiles); all heads processed per step (lane-dense (tq, D) output)
#   * q/k/v read directly from the fused QKV activation (free (B,S,3,H,Dh) view)
#   * key-padding mask built in-kernel from a (B, S) validity vector
# ---------------------------------------------------------------------------

def _attention_kernel(q_ref, k_ref, v_ref, m_ref, o_ref, *, n_heads, scale):
    # q_ref: (tq, H, Dh), k_ref/v_ref: (S, H, Dh), m_ref: (1, S)
    valid = m_ref[...] > 0.5                                # (1, S) bool, broadcast over q rows
    neg = jnp.float32(-1e9)
    q_all = q_ref[...].astype(jnp.float32)
    k_all = k_ref[...].astype(jnp.float32)
    v_all = v_ref[...].astype(jnp.float32)

    outs = []
    for h in range(n_heads):
        q = q_all[:, h, :]                                  # (tq, Dh)
        k = k_all[:, h, :]                                  # (S, Dh)
        v = v_all[:, h, :]                                  # (S, Dh)
        # NT matmul via explicit dot_general (contract last dims) -> no XLU transpose.
        s = jax.lax.dot_general(q, k, (((1,), (1,)), ((), ())),
                                preferred_element_type=jnp.float32) * scale  # (tq, S)
        s = jnp.where(valid, s, neg)
        s = s - jnp.max(s, axis=-1, keepdims=True)
        p = jnp.exp(s)
        p = p / jnp.sum(p, axis=-1, keepdims=True)
        outs.append(jnp.dot(p, v, preferred_element_type=jnp.float32))
    o_ref[...] = jnp.concatenate(outs, axis=-1).astype(o_ref.dtype)


def attention_pallas(qkv, key_valid, n_heads):
    """qkv: (B, S, 3*D) fused QKV activation; key_valid: (B, S) 1/0 -> (B, S, D)."""
    B, S, three_d = qkv.shape
    D = three_d // 3
    Dh = D // n_heads
    scale = 1.0 / math.sqrt(Dh)

    qkv5 = qkv.reshape(B, S, 3, n_heads, Dh)                # free reshape (view)
    mask3 = key_valid.astype(jnp.float32).reshape(B, 1, S)

    # TODO(synk): for very long S, replace the full-KV block with flash-style KV
    # tiling (online softmax); Q-row tiling below keeps VMEM bounded for moderate S.
    tq = S if S <= 256 else 256
    n_qt = pl.cdiv(S, tq)

    est = (2 * (tq * n_heads * Dh + 2 * S * n_heads * Dh + S + tq * D)
           + 4 * tq * S + 2 * tq * D) * 4

    out = pl.pallas_call(
        functools.partial(_attention_kernel, n_heads=n_heads, scale=scale),
        out_shape=jax.ShapeDtypeStruct((B, S, D), qkv.dtype),
        grid_spec=pltpu.PrefetchScalarGridSpec(
            num_scalar_prefetch=0,
            grid=(B, n_qt),
            in_specs=[
                pl.BlockSpec((None, tq, None, n_heads, Dh), lambda b, qt: (b, qt, 0, 0, 0)),
                pl.BlockSpec((None, S, None, n_heads, Dh), lambda b, qt: (b, 0, 1, 0, 0)),
                pl.BlockSpec((None, S, None, n_heads, Dh), lambda b, qt: (b, 0, 2, 0, 0)),
                pl.BlockSpec((None, 1, S), lambda b, qt: (b, 0, 0)),
            ],
            out_specs=pl.BlockSpec((None, tq, D), lambda b, qt: (b, qt, 0)),
        ),
        compiler_params=pltpu.CompilerParams(
            dimension_semantics=("parallel", "arbitrary"),
            vmem_limit_bytes=_vmem_limit(est),
        ),
        cost_estimate=pl.CostEstimate(
            flops=4 * B * S * S * D,
            transcendentals=B * n_heads * S * S,
            bytes_accessed=(4 * B * S * D + B * S) * 4),
    )(qkv5, qkv5, qkv5, mask3)
    return out


def attention_reference(q, k, v, key_valid, scale):
    # q,k,v: (B,H,S,Dh); key_valid: (B,S)
    scores = jnp.einsum('bhqd,bhkd->bhqk', q, k,
                        precision=jax.lax.Precision.HIGHEST) * scale
    mask = key_valid[:, None, None, :]
    scores = jnp.where(mask == 0, -1e9, scores)
    w = jax.nn.softmax(scores, axis=-1)
    return jnp.einsum('bhqk,bhkd->bhqd', w, v,
                      precision=jax.lax.Precision.HIGHEST)


# ---------------------------------------------------------------------------
# Parameters & full-model forward
# ---------------------------------------------------------------------------

def init_params(key, cfg):
    D = cfg['embed_dim']
    Hf = cfg['embed_dim'] * cfg['ffn_dim_multiplier']
    V = cfg['vocab_size']
    n_layers = cfg['n_layers']

    def dense(k, fan_in, fan_out):
        kw, kb = jax.random.split(k)
        w = jax.random.normal(kw, (fan_in, fan_out), jnp.float32) * 0.05
        b = jax.random.normal(kb, (fan_out,), jnp.float32) * 0.01
        return w, b

    keys = jax.random.split(key, n_layers + 2)
    params = {
        'embedding': jax.random.normal(keys[0], (V, D), jnp.float32),
        'out_norm_gamma': jnp.ones((D,), jnp.float32),
        'layers': [],
    }
    params['cls_w'], params['cls_b'] = dense(keys[1], D, 2)
    for li in range(n_layers):
        lk = jax.random.split(keys[2 + li], 7)
        qw, qb = dense(lk[0], D, D)
        kw_, kb_ = dense(lk[1], D, D)
        vw, vb = dense(lk[2], D, D)
        ow, ob = dense(lk[3], D, D)
        gw, gb = dense(lk[4], D, Hf)
        uw, ub = dense(lk[5], D, Hf)
        dw, db = dense(lk[6], Hf, D)
        params['layers'].append(dict(
            norm1_gamma=jnp.ones((D,), jnp.float32),
            norm2_gamma=jnp.ones((D,), jnp.float32),
            # QKV weights packed once at init (one streaming matmul per layer).
            qkv_w=jnp.concatenate([qw, kw_, vw], axis=1),
            qkv_b=jnp.concatenate([qb, kb_, vb], axis=0),
            o_w=ow, o_b=ob,
            gate_w=gw, gate_b=gb, up_w=uw, up_b=ub, down_w=dw, down_b=db))
    return params


def transformer_forward(params, ids, key_valid, cfg, use_pallas=True):
    D = cfg['embed_dim']
    H = cfg['n_heads']
    Dh = D // H
    eps = cfg['eps']
    B, S = ids.shape

    if use_pallas:
        linear = linear_pallas
        rmsnorm = rmsnorm_pallas
    else:
        rmsnorm = rmsnorm_reference
        hi = jax.lax.Precision.HIGHEST

        def linear(x, w, b, residual=None):
            y = jnp.dot(x, w, precision=hi) + b
            return y + residual if residual is not None else y

    # TODO(synk): embedding gather is data-dependent row DMA; done with jnp.take here.
    x = jnp.take(params['embedding'], ids, axis=0)          # (B, S, D)
    # Dropout layers are identity in eval/inference mode.

    for layer in params['layers']:
        normed = rmsnorm(x, layer['norm1_gamma'], eps)
        qkv = linear(normed, layer['qkv_w'], layer['qkv_b'])        # (B, S, 3D)
        if use_pallas:
            attn = attention_pallas(qkv, key_valid, H)              # (B, S, D)
        else:
            q, k, v = jnp.split(qkv, 3, axis=-1)
            q = q.reshape(B, S, H, Dh).transpose(0, 2, 1, 3)
            k = k.reshape(B, S, H, Dh).transpose(0, 2, 1, 3)
            v = v.reshape(B, S, H, Dh).transpose(0, 2, 1, 3)
            attn = attention_reference(q, k, v, key_valid, 1.0 / math.sqrt(Dh))
            attn = attn.transpose(0, 2, 1, 3).reshape(B, S, D)
        x = linear(attn, layer['o_w'], layer['o_b'], residual=x)    # o-proj + residual fused

        normed = rmsnorm(x, layer['norm2_gamma'], eps)
        if use_pallas:
            gated = linear_swiglu_pallas(normed, layer['gate_w'], layer['gate_b'],
                                         layer['up_w'], layer['up_b'])
        else:
            gate = jnp.dot(normed, layer['gate_w'],
                           precision=jax.lax.Precision.HIGHEST) + layer['gate_b']
            up = jnp.dot(normed, layer['up_w'],
                         precision=jax.lax.Precision.HIGHEST) + layer['up_b']
            gated = jax.nn.silu(gate) * up
        x = linear(gated, layer['down_w'], layer['down_b'], residual=x)  # down-proj + residual

    x = rmsnorm(x, params['out_norm_gamma'], eps)
    # TODO(synk): mean-pool over sequence left as jnp glue.
    pooled = jnp.mean(x, axis=1)
    logits = linear(pooled, params['cls_w'], params['cls_b'])
    return logits


# ---------------------------------------------------------------------------
# self-test
# ---------------------------------------------------------------------------

if __name__ == "__main__":
    key = jax.random.PRNGKey(0)
    cfg = dict(vocab_size=64, embed_dim=32, n_heads=4, n_layers=2,
               ffn_dim_multiplier=4, eps=1e-6)
    batch, seq = 2, 8

    k_param, k_ids = jax.random.split(key)
    params = init_params(k_param, cfg)
    ids = jax.random.randint(k_ids, (batch, seq), 0, cfg['vocab_size'])

    # key-padding mask: batch 0 uses all 8 keys, batch 1 only the first 5
    # (equivalent to the PyTorch (B, S, S) src_mask built from key validity).
    lengths = jnp.array([seq, 5])
    key_valid = (jnp.arange(seq)[None, :] < lengths[:, None]).astype(jnp.int32)   # (B, S)

    out = transformer_forward(params, ids, key_valid, cfg, use_pallas=True)
    out = jax.block_until_ready(out)

    ref = transformer_forward(params, ids, key_valid, cfg, use_pallas=False)
    assert out.shape == (batch, 2) and out.dtype == jnp.float32
    assert bool(jnp.allclose(out, ref, atol=2e-3, rtol=2e-3)), (out, ref)
    print("KERNEL_OK")
</pallas_src>

<mosaic_0001>
module attributes {stable_mosaic.version = 11 : i64} {
  func.func @_rmsnorm_kernel(%arg0: i32, %arg1: memref<16x32xf32, #tpu.memory_space<vmem>>, %arg2: memref<1x32xf32, #tpu.memory_space<vmem>>, %arg3: memref<16x32xf32, #tpu.memory_space<vmem>>) attributes {dimension_semantics = [#tpu.dimension_semantics<parallel>], iteration_bounds = array<i64: 1>, scalar_prefetch = 0 : i64, scratch_operands = 0 : i64, tpu.core_type = #tpu.core_type<tc>, window_params = [{transform_indices = @transform_0, window_bounds = array<i64: 16, 32>}, {pipeline_mode = #tpu.pipeline_mode<synchronous>, transform_indices = @transform_1, window_bounds = array<i64: 1, 32>}, {transform_indices = @transform_2, window_bounds = array<i64: 16, 32>}]} {
    %c0 = arith.constant 0 : index
    %c0_0 = arith.constant 0 : index
    %0 = vector.load %arg1[%c0, %c0_0] : memref<16x32xf32, #tpu.memory_space<vmem>>, vector<16x32xf32>
    %c0_1 = arith.constant 0 : index
    %c0_2 = arith.constant 0 : index
    %1 = vector.load %arg2[%c0_1, %c0_2] : memref<1x32xf32, #tpu.memory_space<vmem>>, vector<1x32xf32>
    %2 = arith.mulf %0, %0 : vector<16x32xf32>
    %cst = arith.constant dense<0.000000e+00> : vector<16xf32>
    %3 = vector.multi_reduction <add>, %2, %cst [1] : vector<16x32xf32> to vector<16xf32>
    %4 = vector.shape_cast %3 : vector<16xf32> to vector<16x1xf32>
    %cst_3 = arith.constant 3.200000e+01 : f32
    %5 = vector.broadcast %cst_3 : f32 to vector<16x1xf32>
    %6 = arith.divf %4, %5 : vector<16x1xf32>
    %cst_4 = arith.constant 9.99999997E-7 : f32
    %7 = vector.broadcast %cst_4 : f32 to vector<16x1xf32>
    %8 = arith.addf %6, %7 : vector<16x1xf32>
    %9 = math.rsqrt %8 : vector<16x1xf32>
    %10 = vector.broadcast %9 : vector<16x1xf32> to vector<16x32xf32>
    %11 = arith.mulf %0, %10 : vector<16x32xf32>
    %12 = vector.broadcast %1 : vector<1x32xf32> to vector<16x32xf32>
    %13 = arith.mulf %11, %12 : vector<16x32xf32>
    %c0_5 = arith.constant 0 : index
    %c0_6 = arith.constant 0 : index
    %14 = vector.load %arg3[%c0_5, %c0_6] : memref<16x32xf32, #tpu.memory_space<vmem>>, vector<16x32xf32>
    tpu.vector_store %arg3[%c0_5, %c0_6], %13 {strides = array<i32>} : memref<16x32xf32, #tpu.memory_space<vmem>>, vector<16x32xf32>,
    return
  }
  func.func @transform_0(%arg0: i32) -> (i32, i32) {
    %c0_i32 = arith.constant 0 : i32
    %c0_i32_0 = arith.constant 0 : i32
    return %arg0, %c0_i32 : i32, i32
  }
  func.func @transform_1(%arg0: i32) -> (i32, i32) {
    %c0_i32 = arith.constant 0 : i32
    %c0_i32_0 = arith.constant 0 : i32
    %c0_i32_1 = arith.constant 0 : i32
    return %c0_i32, %c0_i32_0 : i32, i32
  }
  func.func @transform_2(%arg0: i32) -> (i32, i32) {
    %c0_i32 = arith.constant 0 : i32
    %c0_i32_0 = arith.constant 0 : i32
    return %arg0, %c0_i32 : i32, i32
  }
}

</mosaic_0001>

<bundles_post_ra>
// kernel: tpu_custom_call.1
= control target key start
LH: loop header
LB: loop body
LE: loop exit
PB: predicated region body
PF: predicated region fallthrough
CT: control target
= control target key end

     0   :  { %7 = vsyncpa [#allocation3], 0  ;;  %s165_s0 = inlined_call_operand.hbm [shape: f32[16,32], index: 0, kind: input, shape index: {}]   ;;  %s166_s1 = inlined_call_operand.vmem [shape: f32[1,32], index: 1, kind: input, shape index: {}]   ;;  %s167_s2 = inlined_call_operand.hbm [shape: f32[16,32], index: 2, kind: output, shape index: {}]  }
   0x1   :  { %8 = vsyncpa [#allocation4], 0  ;;  %s127_s9 = smov [#allocation2]  }
   0x2   :  { %s14_s10 = sshll.u32 %s127_s9, 4  ;;  %s15_s10 = int_to_ptr.vmem [resolvable:$true] %s14_s10 }
   0x3   :  { %s91_s11 = scalar_lea.vmem %s15_s10, 256  ;;  %p96_p1 = scmp.lt.s32.totalorder %s15_s10, %s15_s10 }
   0x4   :  { %p92_p0 = scmp.ne.s32.totalorder %s15_s10, %s91_s11  ;;  %p97_p2 = scmp.lt.s32.totalorder %s91_s11, %s91_s11 }
   0x6   :  { %p98_p3 = por %p97_p2, %p96_p1 }
   0x8   :  { %p99_p4 = pnand %p98_p3, %p92_p0 }
   0xa   :  { %102 = shalt.err (!%p99_p4)
}
   0xb   :  { %s128_s12 = smov 128   ;;  %s129_s13 = smov 8  }
   0xc   :  { %20 = dma.hbm_to_vmem [thread:$0]  %s165_s0, 256, %s15_s10, [#allocation3], %s128_s12, %s128_s12, %s129_s13  }
   0xd   :  { %123 = dma.done.wait [#allocation3], 256  }
   0xe   :  { %124 = vsyncadd [#allocation3], 4294967040  ;;  %v26_v0 = vld [vmem:[#allocation2] sm:$0xff]  ;;  %vm31_vm0 = vcmask 261120   ;;  %v27_v1 = vld [vmem:[#allocation2 + $0x8] sm:$0xff]  ;;  %s130_s17 = smov [#allocation5]  }
   0xf   :  { %v29_v2 = vmul.f32 %v26_v0, %v26_v0  ;;  %v30_v3 = vmul.f32 %v27_v1, %v27_v1  ;;  %v74_v13 = vld [vmem:[%s166_s1] ss:$0 sm:$0xff]  ;;  %s62_s18 = sshll.u32 %s130_s17, 4  ;;  %s63_s18 = int_to_ptr.vmem [resolvable:$true] %s62_s18 }
  0x10   :  { %s103_s19 = scalar_lea.vmem %s63_s18, 256  ;;  %p108_p6 = scmp.lt.s32.totalorder %s63_s18, %s63_s18 }
  0x11   :  { %v32_v4 = vsel %vm31_vm0, %v29_v2, 0.0  ;;  %v35_v5 = vsel %vm31_vm0, %v30_v3, 0.0  ;;  %p104_p5 = scmp.ne.s32.totalorder %s63_s18, %s103_s19  ;;  %p109_p7 = scmp.lt.s32.totalorder %s103_s19, %s103_s19 }
  0x12   :  { %33 = vadd.xlane.f32.xlu0 %v32_v4 }
  0x13   :  { %p110_p8 = por %p109_p7, %p108_p6 }
  0x15   :  { %p111_p9 = pnand %p110_p8, %p104_p5 }
  0x16   :  { %36 = vadd.xlane.f32.xlu0 %v35_v5 }
  0x9b   :  { %v34_v6 = vpop.xlane.xlu0 %33 }
  0x9c   :  { %v39_v7 = vmul.f32 0.03125, %v34_v6 }
  0x9e   :  { %v41_v8 = vadd.f32 1e-06, %v39_v7 }
  0x9f   :  { %v37_v9 = vpop.xlane.xlu0 %36 }
  0xa0   :  { %79 = vrsqrt.f32 %v41_v8  ;;  %v40_v10 = vmul.f32 0.03125, %v37_v9 }
  0xa2   :  { %v42_v11 = vadd.f32 1e-06, %v40_v10 }
  0xa4   :  { %81 = vrsqrt.f32 %v42_v11 }
  0xad   :  { %v80_v12 = vpop.eup %79 }
  0xae   :  { %v45_v14 = vmul.f32 %v80_v12, %v26_v0 }
  0xb0   :  { %v53_v15 = vmul.f32 %v74_v13, %v45_v14 }
  0xb1   :  { %v82_v16 = vpop.eup %81 }
  0xb2   :  { %v46_v17 = vmul.f32 %v82_v16, %v27_v1  ;;  %55 = vst.msk [vmem:[#allocation5] sm:$0xff] %vm31_vm0, %v53_v15 }
  0xb4   :  { %v54_v18 = vmul.f32 %v74_v13, %v46_v17 }
  0xb6   :  { %56 = vst.msk [vmem:[#allocation5 + $0x8] sm:$0xff] %vm31_vm0, %v54_v18 }
  0xb7   :  { %114 = shalt.err (!%p111_p9)
}
  0xb8   :  { %68 = dma.vmem_to_hbm [thread:$0]  %s63_s18, 256, %s167_s2, [#allocation4], %s128_s12, %s128_s12, %s129_s13  }
  0xb9   :  { %125 = dma.done.wait [#allocation4], 256  }
  0xba   :  { %126 = vsyncadd [#allocation4], 4294967040 }
  0xbb   :  { %72 = vsyncpa [#allocation3], 1 }
  0xbc   :  { %73 = vsyncpa [#allocation4], 1 }

</bundles_post_ra>
